<compile_context>
chip_gen: v7x
topology: tpu7x:2x2x1
jax: 0.10.0
libtpu: 0.0.40
codegen_flags: <defaults>
</compile_context>

<pallas_src>
import functools
import math

import jax
import jax.numpy as jnp
from jax.experimental import pallas as pl
from jax.experimental.pallas import tpu as pltpu


# ---------------------------------------------------------------------------
# One-time parameter preprocessing (hoisted off the forward critical path)
# ---------------------------------------------------------------------------
def prepare_params(params, num_heads):
    E = params["q_w"].shape[0]
    head_dim = E // num_heads
    inv_sqrt_d = 1.0 / math.sqrt(head_dim)
    # nn.Linear: y = x @ W.T + b  ->  pre-transpose; fold 1/sqrt(hd) into Q.
    w_qkv_t = jnp.stack(
        [params["q_w"].T * inv_sqrt_d, params["k_w"].T, params["v_w"].T]
    ).astype(jnp.bfloat16)                                        # (3, E, E)
    b_qkv = jnp.stack(
        [params["q_b"] * inv_sqrt_d, params["k_b"], params["v_b"]]
    ).reshape(3, 1, E).astype(jnp.float32)                        # (3, 1, E)
    return {
        "w_qkv_t": w_qkv_t,
        "b_qkv": b_qkv,
        "wo_t": params["o_w"].T.astype(jnp.bfloat16),             # (E, E)
        "bo": params["o_b"].reshape(1, E).astype(jnp.float32),    # (1, E)
        "num_heads": num_heads,
        "head_dim": head_dim,
    }


# ---------------------------------------------------------------------------
# Kernel 1: fused Q/K/V projection.  grid = (M_tiles,)
# ---------------------------------------------------------------------------
def _qkv_proj_kernel(xq_ref, xk_ref, xv_ref, w_ref, b_ref,
                     q_ref, k_ref, v_ref):
    # x refs: (tm, E) f32 (cast in-kernel); w: (3, E, E) bf16; b: (3, 1, E) f32
    xq = xq_ref[...].astype(jnp.bfloat16)
    xk = xk_ref[...].astype(jnp.bfloat16)
    xv = xv_ref[...].astype(jnp.bfloat16)
    q_ref[...] = (jnp.dot(xq, w_ref[0], preferred_element_type=jnp.float32)
                  + b_ref[0]).astype(q_ref.dtype)
    k_ref[...] = (jnp.dot(xk, w_ref[1], preferred_element_type=jnp.float32)
                  + b_ref[1]).astype(k_ref.dtype)
    v_ref[...] = (jnp.dot(xv, w_ref[2], preferred_element_type=jnp.float32)
                  + b_ref[2]).astype(v_ref.dtype)


def _qkv_row_tile(M, E):
    """Largest row tile that keeps double-buffered VMEM use ~<= 20 MiB."""
    budget = 20 * 1024 * 1024
    per_row = 2 * 3 * (4 + 2) * E   # 2x buffered: 3 f32 inputs + 3 bf16 outputs
    tm = min(M, 2048, max(256, budget // max(per_row, 1)))
    if tm >= M:
        return M
    return max(8, (tm // 8) * 8)


def fused_qkv_projection(query, key, value, prep):
    """Returns (q*1/sqrt(hd), k, v), each (B, S, E) bf16."""
    B, S, E = query.shape
    M = B * S
    xq = query.reshape(M, E)     # metadata-only reshapes, no copies
    xk = key.reshape(M, E)
    xv = value.reshape(M, E)

    tm = _qkv_row_tile(M, E)
    grid = (pl.cdiv(M, tm),)
    row_spec_in = pl.BlockSpec((tm, E), lambda m: (m, 0))
    row_spec_out = pl.BlockSpec((tm, E), lambda m: (m, 0))

    q, k, v = pl.pallas_call(
        _qkv_proj_kernel,
        out_shape=(jax.ShapeDtypeStruct((M, E), jnp.bfloat16),
                   jax.ShapeDtypeStruct((M, E), jnp.bfloat16),
                   jax.ShapeDtypeStruct((M, E), jnp.bfloat16)),
        grid=grid,
        in_specs=[
            row_spec_in, row_spec_in, row_spec_in,
            pl.BlockSpec((3, E, E), lambda m: (0, 0, 0)),   # resident weights
            pl.BlockSpec((3, 1, E), lambda m: (0, 0, 0)),   # resident biases
        ],
        out_specs=(row_spec_out, row_spec_out, row_spec_out),
        compiler_params=pltpu.CompilerParams(
            dimension_semantics=("parallel",)),
    )(xq, xk, xv, prep["w_qkv_t"], prep["b_qkv"])
    return q.reshape(B, S, E), k.reshape(B, S, E), v.reshape(B, S, E)


# ---------------------------------------------------------------------------
# Kernel 2: multi-head attention with fused (per-head) fc_out accumulation.
#   grid = (B, Sq_tiles)
# ---------------------------------------------------------------------------
def _mha_fcout_kernel(q_ref, k_ref, v_ref, mask_ref, wo_ref, bo_ref, *rest,
                      num_heads, head_dim, with_attn_weights):
    if with_attn_weights:
        out_ref, attnw_ref, acc_ref = rest
    else:
        out_ref, acc_ref = rest
        attnw_ref = None

    q_all = q_ref[0]               # (tq, E) bf16, already 1/sqrt(hd)-scaled
    k_all = k_ref[0]               # (S, E) bf16
    v_all = v_ref[0]               # (S, E) bf16
    masked = mask_ref[0] != 0      # (tq, S) bool (int8 input)

    acc_ref[...] = jnp.zeros_like(acc_ref)   # (tq, E) f32 accumulator

    # Static unrolled head loop.
    # TODO(synk): head-batched dot_general (>=128-deep contraction) for v6e/v7x.
    for h in range(num_heads):
        sl = slice(h * head_dim, (h + 1) * head_dim)
        q_h = q_all[:, sl]                   # (tq, hd)
        k_h = k_all[:, sl]                   # (S, hd)
        v_h = v_all[:, sl]                   # (S, hd)

        # q @ k^T: contract last dims on the MXU (no explicit transpose).
        energy = jax.lax.dot_general(
            q_h, k_h, (((1,), (1,)), ((), ())),
            preferred_element_type=jnp.float32)               # (tq, S) f32
        energy = jnp.where(masked, jnp.float32(-1e20), energy)

        # numerically stable softmax in f32
        energy = energy - jnp.max(energy, axis=-1, keepdims=True)
        e = jnp.exp(energy)
        attn = e * pl.reciprocal(jnp.sum(e, axis=-1, keepdims=True), approx=True)
        if attnw_ref is not None:
            attnw_ref[0, h] = attn.astype(attnw_ref.dtype)

        head = jax.lax.dot_general(
            attn.astype(jnp.bfloat16), v_h, (((1,), (0,)), ((), ())),
            preferred_element_type=jnp.float32)               # (tq, hd) f32

        # Fold fc_out per head: acc += head @ Wo[h*hd:(h+1)*hd, :]
        acc_ref[...] += jax.lax.dot_general(
            head.astype(jnp.bfloat16), wo_ref[sl, :], (((1,), (0,)), ((), ())),
            preferred_element_type=jnp.float32)

    # bias once at the end; Dropout is identity in eval mode.
    out_ref[0] = (acc_ref[...] + bo_ref[...]).astype(out_ref.dtype)


def pallas_mha_fcout(q, k, v, mask, wo_t, bo, num_heads, head_dim, *,
                     out_dtype=jnp.bfloat16,
                     attn_weights_dtype=jnp.bfloat16,
                     return_attn_weights=True):
    B, S, E = q.shape
    tq = S if S <= 256 else 256
    n_q = pl.cdiv(S, tq)

    mask_i8 = mask.astype(jnp.int8)          # nonzero == masked, 1 byte/elem
    mask_batch = mask_i8.shape[0]            # 1 => resident across batch axis
    if mask_batch == 1:
        mask_map = lambda b, qi: (0, qi, 0)
    else:
        mask_map = lambda b, qi: (b, qi, 0)

    kernel = functools.partial(
        _mha_fcout_kernel, num_heads=num_heads, head_dim=head_dim,
        with_attn_weights=return_attn_weights)

    in_specs = [
        pl.BlockSpec((1, tq, E), lambda b, qi: (b, qi, 0)),   # q tile
        pl.BlockSpec((1, S, E), lambda b, qi: (b, 0, 0)),     # full K
        pl.BlockSpec((1, S, E), lambda b, qi: (b, 0, 0)),     # full V
        pl.BlockSpec((1, tq, S), mask_map),                   # mask tile
        pl.BlockSpec((E, E), lambda b, qi: (0, 0)),           # Wo (resident)
        pl.BlockSpec((1, E), lambda b, qi: (0, 0)),           # bo (resident)
    ]
    if return_attn_weights:
        out_shape = (
            jax.ShapeDtypeStruct((B, S, E), out_dtype),
            jax.ShapeDtypeStruct((B, num_heads, S, S), attn_weights_dtype),
        )
        out_specs = (
            pl.BlockSpec((1, tq, E), lambda b, qi: (b, qi, 0)),
            pl.BlockSpec((1, num_heads, tq, S), lambda b, qi: (b, 0, qi, 0)),
        )
    else:
        out_shape = jax.ShapeDtypeStruct((B, S, E), out_dtype)
        out_specs = pl.BlockSpec((1, tq, E), lambda b, qi: (b, qi, 0))

    res = pl.pallas_call(
        kernel,
        out_shape=out_shape,
        grid=(B, n_q),
        in_specs=in_specs,
        out_specs=out_specs,
        scratch_shapes=[pltpu.VMEM((tq, E), jnp.float32)],    # fc_out accumulator
        compiler_params=pltpu.CompilerParams(
            dimension_semantics=("parallel", "parallel")),
    )(q, k, v, mask_i8, wo_t, bo)

    if return_attn_weights:
        out, attn_w = res
    else:
        out, attn_w = res, None
    return out, attn_w


# ---------------------------------------------------------------------------
# Forward wrapper (faithful to MultiHeadAttention.forward, eval mode)
# ---------------------------------------------------------------------------
def multi_head_attention_forward(prep, key, query, value, mask, *,
                                 out_dtype=jnp.bfloat16,
                                 attn_weights_dtype=jnp.bfloat16,
                                 return_attn_weights=True):
    q, k, v = fused_qkv_projection(query, key, value, prep)
    return pallas_mha_fcout(
        q, k, v, mask, prep["wo_t"], prep["bo"],
        prep["num_heads"], prep["head_dim"],
        out_dtype=out_dtype, attn_weights_dtype=attn_weights_dtype,
        return_attn_weights=return_attn_weights)


# ---------------------------------------------------------------------------
# Pure-JAX f32 reference (torch semantics) for correctness check
# ---------------------------------------------------------------------------
def reference_forward(params, key, query, value, mask, num_heads):
    B, S, E = key.shape
    hd = E // num_heads
    lin = lambda x, w, b: x @ w.T + b
    k = lin(key, params["k_w"], params["k_b"]).reshape(B, S, num_heads, hd).transpose(0, 2, 1, 3)
    q = lin(query, params["q_w"], params["q_b"]).reshape(B, S, num_heads, hd).transpose(0, 2, 1, 3)
    v = lin(value, params["v_w"], params["v_b"]).reshape(B, S, num_heads, hd).transpose(0, 2, 1, 3)
    energy = jnp.einsum("bhqd,bhkd->bhqk", q, k)
    energy = jnp.where(mask[:, None, :, :], -1e20, energy)
    attn = jax.nn.softmax(energy / math.sqrt(hd), axis=-1)
    out = jnp.einsum("bhqk,bhkd->bhqd", attn, v).transpose(0, 2, 1, 3).reshape(B, S, E)
    out = lin(out, params["o_w"], params["o_b"])
    return out, attn


# ---------------------------------------------------------------------------
# Main
# ---------------------------------------------------------------------------
if __name__ == "__main__":
    B, S, E, H = 2, 8, 32, 4     # batch, seq, embed_dim, num_heads (head_dim = 8)
    dropout_p = 0.1              # unused in eval mode

    root = jax.random.PRNGKey(0)
    ks = jax.random.split(root, 12)
    scale = 1.0 / math.sqrt(E)
    params = {
        "k_w": jax.random.uniform(ks[0], (E, E), jnp.float32, -scale, scale),
        "k_b": jax.random.uniform(ks[1], (E,), jnp.float32, -scale, scale),
        "q_w": jax.random.uniform(ks[2], (E, E), jnp.float32, -scale, scale),
        "q_b": jax.random.uniform(ks[3], (E,), jnp.float32, -scale, scale),
        "v_w": jax.random.uniform(ks[4], (E, E), jnp.float32, -scale, scale),
        "v_b": jax.random.uniform(ks[5], (E,), jnp.float32, -scale, scale),
        "o_w": jax.random.uniform(ks[6], (E, E), jnp.float32, -scale, scale),
        "o_b": jax.random.uniform(ks[7], (E,), jnp.float32, -scale, scale),
    }

    key_in = jax.random.normal(ks[8], (B, S, E), jnp.float32)
    query_in = jax.random.normal(ks[9], (B, S, E), jnp.float32)
    value_in = jax.random.normal(ks[10], (B, S, E), jnp.float32)
    # boolean causal mask, batch-invariant -> shape (1, S, S), True = masked.
    mask = jnp.triu(jnp.ones((S, S), jnp.bool_), k=1)[None]

    prep = prepare_params(params, num_heads=H)   # one-time weight preprocessing

    out, attn_w = multi_head_attention_forward(
        prep, key_in, query_in, value_in, mask,
        out_dtype=jnp.bfloat16, attn_weights_dtype=jnp.bfloat16,
        return_attn_weights=True)
    out = jax.block_until_ready(out)
    attn_w = jax.block_until_ready(attn_w)

    ref_out, ref_attn = reference_forward(
        params, key_in, query_in, value_in, mask, num_heads=H)
    assert out.shape == (B, S, E) and attn_w.shape == (B, H, S, S)
    # bf16 MXU operands / bf16 outputs (f32 accumulation) -> loose tolerances
    assert jnp.allclose(out.astype(jnp.float32), ref_out, atol=5e-2, rtol=5e-2)
    assert jnp.allclose(attn_w.astype(jnp.float32), ref_attn, atol=2e-2, rtol=5e-2)

    print("KERNEL_OK")
</pallas_src>

<mosaic_0001>
module attributes {stable_mosaic.version = 11 : i64} {
  func.func @_qkv_proj_kernel(%arg0: i32, %arg1: memref<16x32xf32, #tpu.memory_space<vmem>>, %arg2: memref<16x32xf32, #tpu.memory_space<vmem>>, %arg3: memref<16x32xf32, #tpu.memory_space<vmem>>, %arg4: memref<3x32x32xbf16, #tpu.memory_space<vmem>>, %arg5: memref<3x1x32xf32, #tpu.memory_space<vmem>>, %arg6: memref<16x32xbf16, #tpu.memory_space<vmem>>, %arg7: memref<16x32xbf16, #tpu.memory_space<vmem>>, %arg8: memref<16x32xbf16, #tpu.memory_space<vmem>>) attributes {dimension_semantics = [#tpu.dimension_semantics<parallel>], iteration_bounds = array<i64: 1>, scalar_prefetch = 0 : i64, scratch_operands = 0 : i64, tpu.core_type = #tpu.core_type<tc>, window_params = [{transform_indices = @transform_0, window_bounds = array<i64: 16, 32>}, {transform_indices = @transform_1, window_bounds = array<i64: 16, 32>}, {transform_indices = @transform_2, window_bounds = array<i64: 16, 32>}, {pipeline_mode = #tpu.pipeline_mode<synchronous>, transform_indices = @transform_3, window_bounds = array<i64: 3, 32, 32>}, {pipeline_mode = #tpu.pipeline_mode<synchronous>, transform_indices = @transform_4, window_bounds = array<i64: 3, 1, 32>}, {transform_indices = @transform_5, window_bounds = array<i64: 16, 32>}, {transform_indices = @transform_6, window_bounds = array<i64: 16, 32>}, {transform_indices = @transform_7, window_bounds = array<i64: 16, 32>}]} {
    %c0 = arith.constant 0 : index
    %c0_0 = arith.constant 0 : index
    %0 = vector.load %arg1[%c0, %c0_0] : memref<16x32xf32, #tpu.memory_space<vmem>>, vector<16x32xf32>
    %1 = arith.truncf %0 : vector<16x32xf32> to vector<16x32xbf16>
    %c0_1 = arith.constant 0 : index
    %c0_2 = arith.constant 0 : index
    %2 = vector.load %arg2[%c0_1, %c0_2] : memref<16x32xf32, #tpu.memory_space<vmem>>, vector<16x32xf32>
    %3 = arith.truncf %2 : vector<16x32xf32> to vector<16x32xbf16>
    %c0_3 = arith.constant 0 : index
    %c0_4 = arith.constant 0 : index
    %4 = vector.load %arg3[%c0_3, %c0_4] : memref<16x32xf32, #tpu.memory_space<vmem>>, vector<16x32xf32>
    %5 = arith.truncf %4 : vector<16x32xf32> to vector<16x32xbf16>
    %c0_5 = arith.constant 0 : index
    %c0_6 = arith.constant 0 : index
    %c0_7 = arith.constant 0 : index
    %6 = vector.load %arg4[%c0_5, %c0_6, %c0_7] : memref<3x32x32xbf16, #tpu.memory_space<vmem>>, vector<1x32x32xbf16>
    %7 = vector.shape_cast %6 : vector<1x32x32xbf16> to vector<32x32xbf16>
    %cst = arith.constant dense<0.000000e+00> : vector<16x32xf32>
    %8 = tpu.matmul %1, %7, %cst {dimension_numbers = #tpu.dot_dimension_numbers<[1], [0], [0], [1], [0, 0, 1, 1], [], []>} : vector<16x32xbf16>, vector<32x32xbf16>, vector<16x32xf32> -> vector<16x32xf32>
    %c0_8 = arith.constant 0 : index
    %c0_9 = arith.constant 0 : index
    %c0_10 = arith.constant 0 : index
    %9 = vector.load %arg5[%c0_8, %c0_9, %c0_10] : memref<3x1x32xf32, #tpu.memory_space<vmem>>, vector<1x1x32xf32>
    %10 = vector.shape_cast %9 : vector<1x1x32xf32> to vector<1x32xf32>
    %11 = vector.broadcast %10 : vector<1x32xf32> to vector<16x32xf32>
    %12 = arith.addf %8, %11 : vector<16x32xf32>
    %13 = arith.truncf %12 : vector<16x32xf32> to vector<16x32xbf16>
    %c0_11 = arith.constant 0 : index
    %c0_12 = arith.constant 0 : index
    %14 = vector.load %arg6[%c0_11, %c0_12] : memref<16x32xbf16, #tpu.memory_space<vmem>>, vector<16x32xbf16>
    tpu.vector_store %arg6[%c0_11, %c0_12], %13 {strides = array<i32>} : memref<16x32xbf16, #tpu.memory_space<vmem>>, vector<16x32xbf16>,
    %c1 = arith.constant 1 : index
    %c0_13 = arith.constant 0 : index
    %c0_14 = arith.constant 0 : index
    %15 = vector.load %arg4[%c1, %c0_13, %c0_14] : memref<3x32x32xbf16, #tpu.memory_space<vmem>>, vector<1x32x32xbf16>
    %16 = vector.shape_cast %15 : vector<1x32x32xbf16> to vector<32x32xbf16>
    %cst_15 = arith.constant dense<0.000000e+00> : vector<16x32xf32>
    %17 = tpu.matmul %3, %16, %cst_15 {dimension_numbers = #tpu.dot_dimension_numbers<[1], [0], [0], [1], [0, 0, 1, 1], [], []>} : vector<16x32xbf16>, vector<32x32xbf16>, vector<16x32xf32> -> vector<16x32xf32>
    %c1_16 = arith.constant 1 : index
    %c0_17 = arith.constant 0 : index
    %c0_18 = arith.constant 0 : index
    %18 = vector.load %arg5[%c1_16, %c0_17, %c0_18] : memref<3x1x32xf32, #tpu.memory_space<vmem>>, vector<1x1x32xf32>
    %19 = vector.shape_cast %18 : vector<1x1x32xf32> to vector<1x32xf32>
    %20 = vector.broadcast %19 : vector<1x32xf32> to vector<16x32xf32>
    %21 = arith.addf %17, %20 : vector<16x32xf32>
    %22 = arith.truncf %21 : vector<16x32xf32> to vector<16x32xbf16>
    %c0_19 = arith.constant 0 : index
    %c0_20 = arith.constant 0 : index
    %23 = vector.load %arg7[%c0_19, %c0_20] : memref<16x32xbf16, #tpu.memory_space<vmem>>, vector<16x32xbf16>
    tpu.vector_store %arg7[%c0_19, %c0_20], %22 {strides = array<i32>} : memref<16x32xbf16, #tpu.memory_space<vmem>>, vector<16x32xbf16>,
    %c2 = arith.constant 2 : index
    %c0_21 = arith.constant 0 : index
    %c0_22 = arith.constant 0 : index
    %24 = vector.load %arg4[%c2, %c0_21, %c0_22] : memref<3x32x32xbf16, #tpu.memory_space<vmem>>, vector<1x32x32xbf16>
    %25 = vector.shape_cast %24 : vector<1x32x32xbf16> to vector<32x32xbf16>
    %cst_23 = arith.constant dense<0.000000e+00> : vector<16x32xf32>
    %26 = tpu.matmul %5, %25, %cst_23 {dimension_numbers = #tpu.dot_dimension_numbers<[1], [0], [0], [1], [0, 0, 1, 1], [], []>} : vector<16x32xbf16>, vector<32x32xbf16>, vector<16x32xf32> -> vector<16x32xf32>
    %c2_24 = arith.constant 2 : index
    %c0_25 = arith.constant 0 : index
    %c0_26 = arith.constant 0 : index
    %27 = vector.load %arg5[%c2_24, %c0_25, %c0_26] : memref<3x1x32xf32, #tpu.memory_space<vmem>>, vector<1x1x32xf32>
    %28 = vector.shape_cast %27 : vector<1x1x32xf32> to vector<1x32xf32>
    %29 = vector.broadcast %28 : vector<1x32xf32> to vector<16x32xf32>
    %30 = arith.addf %26, %29 : vector<16x32xf32>
    %31 = arith.truncf %30 : vector<16x32xf32> to vector<16x32xbf16>
    %c0_27 = arith.constant 0 : index
    %c0_28 = arith.constant 0 : index
    %32 = vector.load %arg8[%c0_27, %c0_28] : memref<16x32xbf16, #tpu.memory_space<vmem>>, vector<16x32xbf16>
    tpu.vector_store %arg8[%c0_27, %c0_28], %31 {strides = array<i32>} : memref<16x32xbf16, #tpu.memory_space<vmem>>, vector<16x32xbf16>,
    return
  }
  func.func @transform_0(%arg0: i32) -> (i32, i32) {
    %c0_i32 = arith.constant 0 : i32
    %c0_i32_0 = arith.constant 0 : i32
    return %arg0, %c0_i32 : i32, i32
  }
  func.func @transform_1(%arg0: i32) -> (i32, i32) {
    %c0_i32 = arith.constant 0 : i32
    %c0_i32_0 = arith.constant 0 : i32
    return %arg0, %c0_i32 : i32, i32
  }
  func.func @transform_2(%arg0: i32) -> (i32, i32) {
    %c0_i32 = arith.constant 0 : i32
    %c0_i32_0 = arith.constant 0 : i32
    return %arg0, %c0_i32 : i32, i32
  }
  func.func @transform_3(%arg0: i32) -> (i32, i32, i32) {
    %c0_i32 = arith.constant 0 : i32
    %c0_i32_0 = arith.constant 0 : i32
    %c0_i32_1 = arith.constant 0 : i32
    %c0_i32_2 = arith.constant 0 : i32
    return %c0_i32, %c0_i32_0, %c0_i32_1 : i32, i32, i32
  }
  func.func @transform_4(%arg0: i32) -> (i32, i32, i32) {
    %c0_i32 = arith.constant 0 : i32
    %c0_i32_0 = arith.constant 0 : i32
    %c0_i32_1 = arith.constant 0 : i32
    %c0_i32_2 = arith.constant 0 : i32
    return %c0_i32, %c0_i32_0, %c0_i32_1 : i32, i32, i32
  }
  func.func @transform_5(%arg0: i32) -> (i32, i32) {
    %c0_i32 = arith.constant 0 : i32
    %c0_i32_0 = arith.constant 0 : i32
    return %arg0, %c0_i32 : i32, i32
  }
  func.func @transform_6(%arg0: i32) -> (i32, i32) {
    %c0_i32 = arith.constant 0 : i32
    %c0_i32_0 = arith.constant 0 : i32
    return %arg0, %c0_i32 : i32, i32
  }
  func.func @transform_7(%arg0: i32) -> (i32, i32) {
    %c0_i32 = arith.constant 0 : i32
    %c0_i32_0 = arith.constant 0 : i32
    return %arg0, %c0_i32 : i32, i32
  }
}

</mosaic_0001>

<bundles_post_ra>
// kernel: tpu_custom_call.1
= control target key start
LH: loop header
LB: loop body
LE: loop exit
PB: predicated region body
PF: predicated region fallthrough
CT: control target
= control target key end

     0   :  { %13 = vsyncpa [#allocation3], 0  ;;  %s816_s0 = inlined_call_operand.hbm [shape: f32[16,32], index: 0, kind: input, shape index: {}]   ;;  %s817_s1 = inlined_call_operand.hbm [shape: f32[16,32], index: 1, kind: input, shape index: {}]   ;;  %s818_s2 = inlined_call_operand.hbm [shape: f32[16,32], index: 2, kind: input, shape index: {}]   ;;  %s819_s3 = inlined_call_operand.hbm [shape: bf16[3,32,32], index: 3, kind: input, shape index: {}]   ;;  %s820_s4 = inlined_call_operand.vmem [shape: f32[3,1,32], index: 4, kind: input, shape index: {}]   ;;  %s821_s5 = inlined_call_operand.hbm [shape: bf16[16,32], index: 5, kind: output, shape index: {0}]   ;;  %s822_s6 = inlined_call_operand.hbm [shape: bf16[16,32], index: 6, kind: output, shape index: {1}]   ;;  %s823_s7 = inlined_call_operand.hbm [shape: bf16[16,32], index: 7, kind: output, shape index: {2}]  }
   0x1   :  { %14 = vsyncpa [#allocation6], 0 }
   0x2   :  { %15 = vsyncpa [#allocation9], 0 }
   0x3   :  { %16 = vsyncpa [#allocation4], 0 }
   0x4   :  { %17 = vsyncpa [#allocation12], 0  ;;  %s619_s24 = smov [#allocation5]   ;;  %s620_s26 = smov [#allocation2]  }
   0x5   :  { %s35_s25 = sshll.u32 %s619_s24, 4  ;;  %s23_s27 = sshll.u32 %s620_s26, 4  ;;  %s36_s25 = int_to_ptr.vmem [resolvable:$true] %s35_s25  ;;  %s672_s27 = int_to_ptr.vmem [resolvable:$true] %s23_s27 }
   0x6   :  { %s455_s30 = scalar_lea.hbm %s817_s1, 256 }
   0x7   :  { %p456_p0 = scmp.ne.s32.totalorder %s817_s1, %s455_s30  ;;  %p459_p1 = scmp.lt.u32.totalorder %s455_s30, %s817_s1 }
   0x9   :  { %p461_p2 = pnand %p459_p1, %p456_p0 }
   0xb   :  { %464 = shalt.err (!%p461_p2)
}
   0xc   :  { %s465_s12 = scalar_lea.vmem %s36_s25, 256  ;;  %p470_p4 = scmp.lt.s32.totalorder %s36_s25, %s36_s25 }
   0xd   :  { %p466_p3 = scmp.ne.s32.totalorder %s36_s25, %s465_s12  ;;  %p471_p5 = scmp.lt.s32.totalorder %s465_s12, %s465_s12 }
   0xf   :  { %p472_p6 = por %p471_p5, %p470_p4 }
  0x11   :  { %p473_p7 = pnand %p472_p6, %p466_p3 }
  0x13   :  { %476 = shalt.err (!%p473_p7)
}
  0x14   :  { %s621_s13 = smov 128   ;;  %s622_s14 = smov 8  }
  0x15   :  { %41 = dma.hbm_to_vmem [thread:$0]  %s817_s1, 256, %s36_s25, [#allocation6], %s621_s13, %s621_s13, %s622_s14  }
  0x16   :  { %s477_s19 = scalar_lea.hbm %s816_s0, 256 }
  0x17   :  { %p478_p8 = scmp.ne.s32.totalorder %s816_s0, %s477_s19  ;;  %p481_p9 = scmp.lt.u32.totalorder %s477_s19, %s816_s0 }
  0x19   :  { %p483_p10 = pnand %p481_p9, %p478_p8 }
  0x1b   :  { %486 = shalt.err (!%p483_p10)
}
  0x1c   :  { %s487_s24 = scalar_lea.vmem %s672_s27, 256  ;;  %p492_p12 = scmp.lt.s32.totalorder %s672_s27, %s672_s27 }
  0x1d   :  { %p488_p11 = scmp.ne.s32.totalorder %s672_s27, %s487_s24  ;;  %p493_p13 = scmp.lt.s32.totalorder %s487_s24, %s487_s24 }
  0x1f   :  { %p494_p0 = por %p493_p13, %p492_p12 }
  0x21   :  { %p495_p1 = pnand %p494_p0, %p488_p11 }
  0x23   :  { %498 = shalt.err (!%p495_p1)
}
  0x24   :  { %29 = dma.hbm_to_vmem [thread:$0]  %s816_s0, 256, %s672_s27, [#allocation3], %s621_s13, %s621_s13, %s622_s14  }
  0x25   :  { %s623_s26 = smov [#allocation7]   ;;  %s624_s29 = smov [#allocation8]  }
  0x26   :  { %s47_s28 = sshll.u32 %s623_s26, 4  ;;  %s59_s30 = sshll.u32 %s624_s29, 4  ;;  %s48_s28 = int_to_ptr.vmem [resolvable:$true] %s47_s28  ;;  %s709_s30 = int_to_ptr.vmem [resolvable:$true] %s59_s30 }
  0x27   :  { %s499_s10 = scalar_lea.hbm %s818_s2, 256 }
  0x28   :  { %p500_p2 = scmp.ne.s32.totalorder %s818_s2, %s499_s10  ;;  %p503_p3 = scmp.lt.u32.totalorder %s499_s10, %s818_s2 }
  0x2a   :  { %p505_p4 = pnand %p503_p3, %p500_p2 }
  0x2c   :  { %508 = shalt.err (!%p505_p4)
}
  0x2d   :  { %s509_s0 = scalar_lea.vmem %s48_s28, 256  ;;  %p514_p6 = scmp.lt.s32.totalorder %s48_s28, %s48_s28 }
  0x2e   :  { %p510_p5 = scmp.ne.s32.totalorder %s48_s28, %s509_s0  ;;  %p515_p7 = scmp.lt.s32.totalorder %s509_s0, %s509_s0 }
  0x30   :  { %p516_p8 = por %p515_p7, %p514_p6 }
  0x32   :  { %p517_p9 = pnand %p516_p8, %p510_p5 }
  0x34   :  { %520 = shalt.err (!%p517_p9)
}
  0x35   :  { %53 = dma.hbm_to_vmem [thread:$0]  %s818_s2, 256, %s48_s28, [#allocation6], %s621_s13, %s621_s13, %s622_s14  }
  0x36   :  { %s521_s20 = scalar_lea.hbm %s819_s3, 768 }
  0x37   :  { %p522_p10 = scmp.ne.s32.totalorder %s819_s3, %s521_s20  ;;  %p525_p11 = scmp.lt.u32.totalorder %s521_s20, %s819_s3 }
  0x39   :  { %p527_p12 = pnand %p525_p11, %p522_p10 }
  0x3b   :  { %530 = shalt.err (!%p527_p12)
}
  0x3c   :  { %s531_s1 = scalar_lea.vmem %s709_s30, 768  ;;  %p536_p0 = scmp.lt.s32.totalorder %s709_s30, %s709_s30 }
  0x3d   :  { %p532_p13 = scmp.ne.s32.totalorder %s709_s30, %s531_s1  ;;  %p537_p1 = scmp.lt.s32.totalorder %s531_s1, %s531_s1 }
  0x3f   :  { %p538_p2 = por %p537_p1, %p536_p0 }
  0x41   :  { %p539_p3 = pnand %p538_p2, %p532_p13 }
  0x43   :  { %542 = shalt.err (!%p539_p3)
}
  0x44   :  { %s625_s2 = smov 64   ;;  %s626_s13 = smov 4  }
  0x45   :  { %65 = dma.hbm_to_vmem [thread:$0]  %s819_s3, 768, %s709_s30, [#allocation9], %s625_s2, %s625_s2, %s626_s13  }
  0x46   :  { %609 = dma.done.wait [#allocation3], 256  }
  0x47   :  { %610 = vsyncadd [#allocation3], 4294967040 }
  0x48   :  { %611 = dma.done.wait [#allocation6], 512  }
  0x49   :  { %612 = vsyncadd [#allocation6], 4294966784 }
  0x4a   :  { %613 = dma.done.wait [#allocation9], 768  }
  0x4b   :  { %614 = vsyncadd [#allocation9], 4294966528  ;;  %v627_v0 = vmov 0.0   ;;  %vm628_vm0 = vmmov 0   ;;  %v449_v1 = vld [vmem:[#allocation8] sm:$0xff]   ;;  %v450_v2 = vld [vmem:[#allocation8 + $0x8] sm:$0xff]  }
  0x4c   :  { %412 = vmatprep.subr.bf16.mxu0 %v627_v0  ;;  %420 = vmatprep.subr.bf16.mxu1 %v627_v0  ;;  %v451_v3 = vld [vmem:[#allocation8 + $0x10] sm:$0xff]   ;;  %v82_v5 = vld [vmem:[#allocation2 + $0x8] sm:$0xff]  ;;  %v452_v6 = vld [vmem:[#allocation8 + $0x20] sm:$0xff]   ;;  %vm113_vm1 = vcmask 261120   ;;  %vm166_vm2 = vcmask 257024   ;;  %s629_s30 = smov [#allocation10]  }
  0x4d   :  { %416 = vmatprep.mubr.msk.bf16.mxu0 %vm628_vm0, %v627_v0  ;;  %424 = vmatprep.mubr.msk.bf16.mxu1 %vm628_vm0, %v627_v0  ;;  %v81_v4 = vld [vmem:[#allocation2] sm:$0xff]  ;;  %v453_v8 = vld [vmem:[#allocation8 + $0x18] sm:$0xff]   ;;  %v84_v9 = vld [vmem:[#allocation5] sm:$0xff]  ;;  %s332_s8 = sshll.u32 %s629_s30, 4  ;;  %s630_s9 = smov [#allocation11]   ;;  %s333_s8 = int_to_ptr.vmem [resolvable:$true] %s332_s8 }
  0x4e   :  { %413 = vmatpush3.bf16.msra.mxu0 %v449_v1  ;;  %421 = vmatpush3.bf16.msra.mxu1 %v451_v3  ;;  %v83_v7 = vpack.c.bf16 %v82_v5, %v81_v4  ;;  %v85_v10 = vld [vmem:[#allocation5 + $0x8] sm:$0xff]  ;;  %v87_v13 = vld [vmem:[#allocation7] sm:$0xff]  ;;  %v88_v14 = vld [vmem:[#allocation7 + $0x8] sm:$0xff]  ;;  %s344_s10 = sshll.u32 %s630_s9, 4  ;;  %s543_s15 = scalar_lea.vmem %s333_s8, 128  ;;  %s761_s10 = int_to_ptr.vmem [resolvable:$true] %s344_s10 }
  0x4f   :  { %414 = vmatprep.subr.bf16.mxu0 %v627_v0  ;;  %422 = vmatprep.subr.bf16.mxu1 %v627_v0  ;;  %v86_v11 = vpack.c.bf16 %v85_v10, %v84_v9  ;;  %v454_v12 = vld [vmem:[#allocation8 + $0x28] sm:$0xff]   ;;  %v89_v15 = vpack.c.bf16 %v88_v14, %v87_v13  ;;  %v377_v16 = vld [vmem:[%s820_s4] ss:$0 sm:$0xff]  ;;  %v384_v18 = vld [vmem:[%s820_s4 + $0x1] ss:$0 sm:$0xff]  ;;  %p544_p4 = scmp.ne.s32.totalorder %s333_s8, %s543_s15  ;;  %p548_p5 = scmp.lt.s32.totalorder %s333_s8, %s333_s8 }
  0x50   :  { %v391_v33 = vld [vmem:[%s820_s4 + $0x2] ss:$0 sm:$0xff]  ;;  %p549_p6 = scmp.lt.s32.totalorder %s543_s15, %s543_s15 }
  0x52   :  { %415 = vmatpush3.bf16.msra.mxu0 %v450_v2  ;;  %423 = vmatpush3.bf16.msra.mxu1 %v453_v8  ;;  %p550_p7 = por %p549_p6, %p548_p5 }
  0x53   :  { %428 = vmatprep.subr.bf16.mxu0 %v627_v0 }
  0x54   :  { %p551_p8 = pnand %p550_p7, %p544_p4 }
  0x55   :  { %417 = vmatmul.mubr.msk.bf16.vlgmr.msra.gmra.mrb[0].mxu0 %vm113_vm1, %v83_v7  ;;  %425 = vmatmul.mubr.msk.bf16.vlgmr.msra.gmra.mrb[0].mxu1 %vm113_vm1, %v86_v11 }
  0x56   :  { %429 = vmatpush3.bf16.msra.mxu0 %v452_v6  ;;  %432 = vmatprep.mubr.msk.bf16.mxu0 %vm628_vm0, %v627_v0 }
  0x57   :  { %430 = vmatprep.subr.bf16.mxu0 %v627_v0 }
  0x5a   :  { %431 = vmatpush3.bf16.msra.mxu0 %v454_v12 }
  0x5d   :  { %433 = vmatmul.mubr.msk.bf16.vlgmr.msra.gmra.mrb[4].mxu0 %vm113_vm1, %v89_v15 }
 0x128   :  { %v151_v17 = vpop.f32.mrb[0].mxu0  ;;  %v231_v22 = vpop.f32.mrb[0].mxu1 }
 0x129   :  { %v152_v19 = vadd.f32 %v377_v16, %v151_v17  ;;  %v418_v20 = vpop.f32.mrb[1].mxu0  ;;  %v232_v26 = vadd.f32 %v384_v18, %v231_v22  ;;  %v426_v27 = vpop.f32.mrb[1].mxu1 }
 0x12a   :  { %v154_v21 = vpop.f32.mrb[2].mxu0  ;;  %v234_v28 = vpop.f32.mrb[2].mxu1 }
 0x12b   :  { %v397_v23 = vpack.c.bf16 %v152_v19, %v152_v19  ;;  %v155_v24 = vadd.f32 %v377_v16, %v154_v21  ;;  %v419_v25 = vpop.f32.mrb[3].mxu0  ;;  %v399_v30 = vpack.c.bf16 %v232_v26, %v232_v26  ;;  %v235_v31 = vadd.f32 %v384_v18, %v234_v28  ;;  %v427_v32 = vpop.f32.mrb[3].mxu1 }
 0x12d   :  { %v398_v29 = vpack.c.bf16 %v155_v24, %v155_v24  ;;  %167 = vst.msk [vmem:[#allocation10] sm:$0xf] %vm166_vm2, %v397_v23  ;;  %v400_v34 = vpack.c.bf16 %v235_v31, %v235_v31  ;;  %246 = vst.msk [vmem:[#allocation11] sm:$0xf] %vm166_vm2, %v399_v30 }
 0x12f   :  { %168 = vst.msk [vmem:[#allocation10 + $0x4] sm:$0xf] %vm166_vm2, %v398_v29 }
 0x130   :  { %v310_v35 = vpop.f32.mrb[4].mxu0 }
 0x131   :  { %554 = shalt.err (!%p551_p8)
}
 0x132   :  { %s555_s27 = scalar_lea.hbm %s821_s5, 128 }
 0x133   :  { %p556_p9 = scmp.ne.s32.totalorder %s821_s5, %s555_s27  ;;  %p559_p10 = scmp.lt.u32.totalorder %s555_s27, %s821_s5 }
 0x135   :  { %p561_p11 = pnand %p559_p10, %p556_p9 }
 0x137   :  { %564 = shalt.err (!%p561_p11)
}
 0x138   :  { %338 = dma.vmem_to_hbm [thread:$0]  %s333_s8, 128, %s821_s5, [#allocation4], %s625_s2, %s625_s2, %s626_s13   ;;  %v311_v36 = vadd.f32 %v391_v33, %v310_v35  ;;  %247 = vst.msk [vmem:[#allocation11 + $0x4] sm:$0xf] %vm166_vm2, %v400_v34  ;;  %v434_v37 = vpop.f32.mrb[5].mxu0 }
 0x139   :  { %s631_s22 = smov [#allocation13]   ;;  %v313_v38 = vpop.f32.mrb[6].mxu0  ;;  %s565_s24 = scalar_lea.vmem %s761_s10, 128 }
 0x13a   :  { %s356_s23 = sshll.u32 %s631_s22, 4  ;;  %p566_p12 = scmp.ne.s32.totalorder %s761_s10, %s565_s24  ;;  %s357_s23 = int_to_ptr.vmem [resolvable:$true] %s356_s23 }
 0x13b   :  { %p570_p13 = scmp.lt.s32.totalorder %s761_s10, %s761_s10  ;;  %p571_p0 = scmp.lt.s32.totalorder %s565_s24, %s565_s24 }
 0x13d   :  { %p572_p1 = por %p571_p0, %p570_p13 }
 0x13f   :  { %p573_p2 = pnand %p572_p1, %p566_p12 }
 0x141   :  { %576 = shalt.err (!%p573_p2)
}
 0x142   :  { %s577_s25 = scalar_lea.hbm %s822_s6, 128 }
 0x143   :  { %p578_p3 = scmp.ne.s32.totalorder %s822_s6, %s577_s25  ;;  %p581_p4 = scmp.lt.u32.totalorder %s577_s25, %s822_s6 }
 0x145   :  { %p583_p5 = pnand %p581_p4, %p578_p3 }
 0x147   :  { %586 = shalt.err (!%p583_p5)
}
 0x148   :  { %350 = dma.vmem_to_hbm [thread:$0]  %s761_s10, 128, %s822_s6, [#allocation12], %s625_s2, %s625_s2, %s626_s13   ;;  %v401_v39 = vpack.c.bf16 %v311_v36, %v311_v36  ;;  %v314_v40 = vadd.f32 %v391_v33, %v313_v38  ;;  %v435_v41 = vpop.f32.mrb[7].mxu0 }
 0x149   :  { %s587_s8 = scalar_lea.vmem %s357_s23, 128  ;;  %p592_p7 = scmp.lt.s32.totalorder %s357_s23, %s357_s23 }
 0x14a   :  { %325 = vst.msk [vmem:[#allocation13] sm:$0xf] %vm166_vm2, %v401_v39  ;;  %v402_v42 = vpack.c.bf16 %v314_v40, %v314_v40  ;;  %p588_p6 = scmp.ne.s32.totalorder %s357_s23, %s587_s8  ;;  %p593_p8 = scmp.lt.s32.totalorder %s587_s8, %s587_s8 }
 0x14c   :  { %326 = vst.msk [vmem:[#allocation13 + $0x4] sm:$0xf] %vm166_vm2, %v402_v42  ;;  %p594_p9 = por %p593_p8, %p592_p7 }
 0x14e   :  { %p595_p10 = pnand %p594_p9, %p588_p6 }
 0x150   :  { %598 = shalt.err (!%p595_p10)
}
 0x151   :  { %s599_s6 = scalar_lea.hbm %s823_s7, 128 }
 0x152   :  { %p600_p11 = scmp.ne.s32.totalorder %s823_s7, %s599_s6  ;;  %p603_p12 = scmp.lt.u32.totalorder %s599_s6, %s823_s7 }
 0x154   :  { %p605_p13 = pnand %p603_p12, %p600_p11 }
 0x156   :  { %608 = shalt.err (!%p605_p13)
}
 0x157   :  { %362 = dma.vmem_to_hbm [thread:$0]  %s357_s23, 128, %s823_s7, [#allocation12], %s625_s2, %s625_s2, %s626_s13  }
 0x158   :  { %615 = dma.done.wait [#allocation4], 128  }
 0x159   :  { %616 = vsyncadd [#allocation4], 4294967168 }
 0x15a   :  { %617 = dma.done.wait [#allocation12], 256  }
 0x15b   :  { %618 = vsyncadd [#allocation12], 4294967040 }
 0x15c   :  { %372 = vsyncpa [#allocation3], 1 }
 0x15d   :  { %373 = vsyncpa [#allocation6], 1 }
 0x15e   :  { %374 = vsyncpa [#allocation9], 1 }
 0x15f   :  { %375 = vsyncpa [#allocation4], 1 }
 0x160   :  { %376 = vsyncpa [#allocation12], 1 }

</bundles_post_ra>
